<compile_context>
chip_gen: v7x
topology: tpu7x:2x2x1
jax: 0.10.0
libtpu: 0.0.40
codegen_flags: <defaults>
</compile_context>

<pallas_src>
import jax
import jax.numpy as jnp
from jax import lax
from jax.experimental import pallas as pl
from jax.experimental.pallas import tpu as pltpu

BN_EPS = 1e-5
LANE = 128
VMEM_LIMIT = 48 * 1024 * 1024     # v7x-safe scoped-VMEM ceiling


def _round_up(x, m):
    return (x + m - 1) // m * m


def _row_tile(m, cap=2048):
    """Row tile for flat (M, 128) passes: whole array when small, else the
    largest multiple-of-8 divisor of M that is <= cap (keeps mem-bound passes
    at >=512-row lane-dense tiles for realistic ResNet sizes)."""
    if m <= cap:
        return m
    t = cap - cap % 8
    while t >= 8:
        if m % t == 0:
            return t
        t -= 8
    return m


def _conv_row_tile(ho, wo, target=256):
    """Output-row tile for the conv kernels: largest divisor of Ho whose
    (rows*Wo, 128) output tile is legal (8-sublane multiple or full extent)
    and <= ~target pixels, bounding the f32 accumulator to vreg scale."""
    cands = [t for t in range(1, ho + 1)
             if ho % t == 0 and ((t * wo) % 8 == 0 or t == ho)]
    fits = [t for t in cands if t * wo <= target]
    return max(fits) if fits else min(cands)


# ---------------------------------------------------------------------------
# Pallas kernels
# ---------------------------------------------------------------------------
def _make_conv3x3_kernel(stride, tile_h, wo, cin):
    """3x3/pad-1 conv over a phase-split, zero-padded NHWC image.

    Per grid step, the 9 shifted tap windows are copied into one
    (P_tile, 9*Cin) VMEM patch buffer and contracted with a SINGLE bf16 MXU
    matmul (f32 accumulation).  Per-step BN partial statistics are emitted and
    reduced in plain JAX, so both grid axes stay "parallel".
    """
    s = stride
    ptile = tile_h * wo

    def kernel(x_ref, w_ref, out_ref, stat_ref, patch_ref):
        row0 = pl.program_id(1) * tile_h
        for kh in range(3):
            for kw in range(3):
                ph = (kh % s) * s + (kw % s)          # stride phase
                tap = x_ref[0, pl.ds(row0 + kh // s, tile_h),
                            kw // s:kw // s + wo,
                            ph * cin:(ph + 1) * cin]
                idx = kh * 3 + kw
                patch_ref[:, idx * cin:(idx + 1) * cin] = tap.reshape(ptile, cin)
        acc = jnp.dot(patch_ref[...], w_ref[...],
                      preferred_element_type=jnp.float32)
        out_ref[0] = acc.astype(out_ref.dtype)
        # Two sub-row stat stores (kept as plain partial stores for robustness;
        # they are far off the critical path once the kernel is MXU-bound).
        stat_ref[0, 0, 0:1, :] = jnp.sum(acc, axis=0, keepdims=True)
        stat_ref[0, 0, 1:2, :] = jnp.sum(acc * acc, axis=0, keepdims=True)

    return kernel


def _make_bn_relu_pad_kernel(ho, wo):
    """bn1 affine + relu fused with conv2's zero padding: writes the activated
    tile into the interior of a zeroed (Ho+2, Wo+2, C) bf16 block."""
    def kernel(x_ref, s_ref, b_ref, o_ref):
        y = jnp.maximum(x_ref[0].astype(jnp.float32) * s_ref[...] + b_ref[...],
                        0.0)
        o_ref[...] = jnp.zeros(o_ref.shape, o_ref.dtype)
        o_ref[0, 1:1 + ho, 1:1 + wo, :] = (
            y.reshape(ho, wo, -1).astype(o_ref.dtype))
    return kernel


def _matmul_stats_kernel(x_ref, w_ref, out_ref, stat_ref):
    """Shortcut 1x1-conv-as-matmul (bf16 MXU, f32 acc) + BN partial stats."""
    acc = jnp.dot(x_ref[...], w_ref[...], preferred_element_type=jnp.float32)
    out_ref[...] = acc.astype(out_ref.dtype)
    stat_ref[0, 0:1, :] = jnp.sum(acc, axis=0, keepdims=True)
    stat_ref[0, 1:2, :] = jnp.sum(acc * acc, axis=0, keepdims=True)


def _residual_proj_kernel(x_ref, sx_ref, bx_ref, r_ref, sr_ref, br_ref, o_ref):
    """Fused: bn2 affine + shortcut-BN affine + residual add + relu."""
    y = (x_ref[...].astype(jnp.float32) * sx_ref[...] + bx_ref[...]
         + r_ref[...].astype(jnp.float32) * sr_ref[...] + br_ref[...])
    o_ref[...] = jnp.maximum(y, 0.0)


def _make_residual_id_kernel(cr, cp):
    """Fused: bn2 affine + identity residual add + relu.  The residual carries
    only its true `cr` channels (no HBM channel padding); lanes >= cr of the
    output are sliced off in the wrapper."""
    def kernel(x_ref, sx_ref, bx_ref, r_ref, o_ref):
        y = x_ref[...].astype(jnp.float32) * sx_ref[...] + bx_ref[...]
        r = r_ref[...].astype(jnp.float32)
        if cr == cp:
            o_ref[...] = jnp.maximum(y + r, 0.0)
        else:
            o_ref[...] = jnp.maximum(y, 0.0)
            o_ref[:, :cr] = jnp.maximum(y[:, :cr] + r, 0.0)
    return kernel


# ---------------------------------------------------------------------------
# pallas_call wrappers
# ---------------------------------------------------------------------------
def conv3x3_bn_stats(xph, w_mat, stride, cin, ho, wo, cp):
    """xph: (N, Hph, Wph, s*s*cin) bf16 padded/phase-split image.
    w_mat: (9*cin, cp) bf16.  Returns conv (N, Ho*Wo, cp) bf16 and summed BN
    statistics (2, cp) f32."""
    n, hph, wph, ct = xph.shape
    tile_h = _conv_row_tile(ho, wo)
    nt = ho // tile_h
    p = ho * wo
    conv, stats = pl.pallas_call(
        _make_conv3x3_kernel(stride, tile_h, wo, cin),
        out_shape=(jax.ShapeDtypeStruct((n, p, cp), jnp.bfloat16),
                   jax.ShapeDtypeStruct((n, nt, 2, cp), jnp.float32)),
        grid_spec=pltpu.PrefetchScalarGridSpec(
            num_scalar_prefetch=0,
            grid=(n, nt),
            in_specs=[pl.BlockSpec((1, hph, wph, ct), lambda i, t: (i, 0, 0, 0)),
                      pl.BlockSpec((9 * cin, cp), lambda i, t: (0, 0))],
            out_specs=[pl.BlockSpec((1, tile_h * wo, cp),
                                    lambda i, t: (i, t, 0)),
                       pl.BlockSpec((1, 1, 2, cp), lambda i, t: (i, t, 0, 0))],
            scratch_shapes=[pltpu.VMEM((tile_h * wo, 9 * cin), jnp.bfloat16)]),
        compiler_params=pltpu.CompilerParams(
            dimension_semantics=("parallel", "parallel"),
            vmem_limit_bytes=VMEM_LIMIT),
    )(xph, w_mat)
    return conv, jnp.sum(stats, axis=(0, 1))


def bn_relu_pad(c, scale, bias, n, ho, wo, cp):
    """relu(c*scale+bias) written into the interior of a zero-padded
    (N, Ho+2, Wo+2, cp) bf16 buffer (directly usable as conv2's input)."""
    p = ho * wo
    return pl.pallas_call(
        _make_bn_relu_pad_kernel(ho, wo),
        out_shape=jax.ShapeDtypeStruct((n, ho + 2, wo + 2, cp), jnp.bfloat16),
        grid_spec=pltpu.PrefetchScalarGridSpec(
            num_scalar_prefetch=0,
            grid=(n,),
            in_specs=[pl.BlockSpec((1, p, cp), lambda i: (i, 0, 0)),
                      pl.BlockSpec((1, cp), lambda i: (0, 0)),
                      pl.BlockSpec((1, cp), lambda i: (0, 0))],
            out_specs=pl.BlockSpec((1, ho + 2, wo + 2, cp),
                                   lambda i: (i, 0, 0, 0))),
        compiler_params=pltpu.CompilerParams(
            dimension_semantics=("parallel",),
            vmem_limit_bytes=VMEM_LIMIT),
    )(c, scale.reshape(1, cp), bias.reshape(1, cp))


def matmul_bn_stats(x2d, w2d, cp):
    """Projection shortcut: (M, K) bf16 @ (K, cp) bf16 -> (M, cp) bf16 + stats."""
    m, k = x2d.shape
    tm = _row_tile(m)
    nt = m // tm
    out, stats = pl.pallas_call(
        _matmul_stats_kernel,
        out_shape=(jax.ShapeDtypeStruct((m, cp), jnp.bfloat16),
                   jax.ShapeDtypeStruct((nt, 2, cp), jnp.float32)),
        grid_spec=pltpu.PrefetchScalarGridSpec(
            num_scalar_prefetch=0,
            grid=(nt,),
            in_specs=[pl.BlockSpec((tm, k), lambda i: (i, 0)),
                      pl.BlockSpec((k, cp), lambda i: (0, 0))],
            out_specs=[pl.BlockSpec((tm, cp), lambda i: (i, 0)),
                       pl.BlockSpec((1, 2, cp), lambda i: (i, 0, 0))]),
        compiler_params=pltpu.CompilerParams(
            dimension_semantics=("parallel",),
            vmem_limit_bytes=VMEM_LIMIT),
    )(x2d, w2d)
    return out, jnp.sum(stats, axis=0)


def residual_relu_proj(x2d, sx, bx, r2d, sr, br, cp):
    m = x2d.shape[0]
    tm = _row_tile(m)
    row = pl.BlockSpec((tm, cp), lambda i: (i, 0))
    vec = pl.BlockSpec((1, cp), lambda i: (0, 0))
    return pl.pallas_call(
        _residual_proj_kernel,
        out_shape=jax.ShapeDtypeStruct((m, cp), jnp.float32),
        grid_spec=pltpu.PrefetchScalarGridSpec(
            num_scalar_prefetch=0,
            grid=(m // tm,),
            in_specs=[row, vec, vec, row, vec, vec],
            out_specs=row),
        compiler_params=pltpu.CompilerParams(
            dimension_semantics=("parallel",),
            vmem_limit_bytes=VMEM_LIMIT),
    )(x2d, sx.reshape(1, cp), bx.reshape(1, cp),
      r2d, sr.reshape(1, cp), br.reshape(1, cp))


def residual_relu_identity(x2d, sx, bx, r2d, cp):
    m, cr = r2d.shape
    tm = _row_tile(m)
    return pl.pallas_call(
        _make_residual_id_kernel(cr, cp),
        out_shape=jax.ShapeDtypeStruct((m, cp), jnp.float32),
        grid_spec=pltpu.PrefetchScalarGridSpec(
            num_scalar_prefetch=0,
            grid=(m // tm,),
            in_specs=[pl.BlockSpec((tm, cp), lambda i: (i, 0)),
                      pl.BlockSpec((1, cp), lambda i: (0, 0)),
                      pl.BlockSpec((1, cp), lambda i: (0, 0)),
                      pl.BlockSpec((tm, cr), lambda i: (i, 0))],
            out_specs=pl.BlockSpec((tm, cp), lambda i: (i, 0))),
        compiler_params=pltpu.CompilerParams(
            dimension_semantics=("parallel",),
            vmem_limit_bytes=VMEM_LIMIT),
    )(x2d, sx.reshape(1, cp), bx.reshape(1, cp), r2d)


# ---------------------------------------------------------------------------
# Plain-JAX glue
# ---------------------------------------------------------------------------
def _prep_conv_input(x_bf16, stride):
    """Zero-pad (pad=1) and phase-split the NHWC image along the channel axis
    so every in-kernel tap read is a contiguous static window.  stride in {1,2}."""
    n, h, w, c = x_bf16.shape
    s = stride
    ho = (h - 1) // s + 1
    wo = (w - 1) // s + 1
    hph = ho + 2 // s
    wph = wo + 2 // s
    xp = jnp.pad(x_bf16, ((0, 0), (1, s * hph - h - 1),
                          (1, s * wph - w - 1), (0, 0)))
    if s == 1:
        return xp, ho, wo
    phases = [xp[:, a::s, b::s, :][:, :hph, :wph, :]
              for a in range(s) for b in range(s)]
    return jnp.concatenate(phases, axis=-1), ho, wo


def _conv_weight_mat(w, cin_pad, cp):
    """(Cout, Cin, 3, 3) -> (9*cin_pad, cp) bf16 matching the in-kernel patch
    layout [(kh, kw) major, cin minor]; zero-padded on Cin/Cout."""
    cout, cin = w.shape[0], w.shape[1]
    wt = jnp.transpose(w.astype(jnp.float32), (2, 3, 1, 0))      # (3,3,Cin,Cout)
    wt = jnp.pad(wt, ((0, 0), (0, 0), (0, cin_pad - cin), (0, cp - cout)))
    return wt.reshape(9 * cin_pad, cp).astype(jnp.bfloat16)


def _pad_c(v, cp):
    return jnp.pad(v.astype(jnp.float32), (0, cp - v.shape[0]))


def bn_fold(stats, gamma, beta, count):
    """Fold training-mode BN (batch statistics) into per-channel scale/bias."""
    mean = stats[0] / count
    var = jnp.maximum(stats[1] / count - mean * mean, 0.0)       # clamp >= 0
    scale = gamma * lax.rsqrt(var + BN_EPS)
    bias = beta - mean * scale
    return scale, bias


def basic_block_forward(x_nchw, params, stride):
    assert stride in (1, 2), "phase decomposition implemented for stride 1 and 2"
    in_planes = x_nchw.shape[1]
    planes = params["w1"].shape[0]
    cp = _round_up(planes, LANE)

    # TODO(synk): the boundary NCHW<->NHWC transposes only exist to honor the
    # module's NCHW interface; a full NHWC ResNet would drop them.
    x = jnp.transpose(x_nchw, (0, 2, 3, 1)).astype(jnp.float32)   # NHWC f32
    n = x.shape[0]
    x_bf = x.astype(jnp.bfloat16)

    # conv1 (3x3, stride) -> per-channel batch statistics
    xph1, ho, wo = _prep_conv_input(x_bf, stride)
    wm1 = _conv_weight_mat(params["w1"], in_planes, cp)
    c1, st1 = conv3x3_bn_stats(xph1, wm1, stride, in_planes, ho, wo, cp)
    p = ho * wo
    m = n * p
    count = m
    s1, b1 = bn_fold(st1, _pad_c(params["g1"], cp), _pad_c(params["be1"], cp),
                     count)

    # bn1 affine + relu fused with conv2's zero padding (single bf16 pass)
    x2ph = bn_relu_pad(c1, s1, b1, n, ho, wo, cp)      # (N, Ho+2, Wo+2, cp)

    # conv2 (3x3, stride 1); bn2 affine deferred to the fused epilogue
    wm2 = _conv_weight_mat(params["w2"], cp, cp)
    c2, st2 = conv3x3_bn_stats(x2ph, wm2, 1, cp, ho, wo, cp)
    s2, b2 = bn_fold(st2, _pad_c(params["g2"], cp), _pad_c(params["be2"], cp),
                     count)

    if stride != 1 or in_planes != planes:
        # projection shortcut: strided 1x1 conv as a matmul + its BN
        xs = x_bf[:, ::stride, ::stride, :].reshape(m, in_planes)
        ws = jnp.pad(params["ws"][:, :, 0, 0].astype(jnp.float32).T,
                     ((0, 0), (0, cp - planes))).astype(jnp.bfloat16)
        r, sts = matmul_bn_stats(xs, ws, cp)
        sr, br = bn_fold(sts, _pad_c(params["gs"], cp),
                         _pad_c(params["bes"], cp), count)
        out = residual_relu_proj(c2.reshape(m, cp), s2, b2, r, sr, br, cp)
    else:
        # identity shortcut: unpadded f32 residual, no extra HBM pass
        r = x.reshape(m, in_planes)
        out = residual_relu_identity(c2.reshape(m, cp), s2, b2, r, cp)

    out = out.reshape(n, ho, wo, cp)[..., :planes]
    return jnp.transpose(out, (0, 3, 1, 2))                       # NCHW


# ---------------------------------------------------------------------------
# Pure-JAX reference (mirrors the PyTorch forward in train mode, f32 HIGHEST)
# ---------------------------------------------------------------------------
def ref_basic_block(x, params, stride):
    def conv(x, w, s, pad):
        return lax.conv_general_dilated(
            x, w, (s, s), ((pad, pad), (pad, pad)),
            dimension_numbers=("NCHW", "OIHW", "NCHW"),
            precision=lax.Precision.HIGHEST)

    def bn(x, g, b):
        mean = jnp.mean(x, axis=(0, 2, 3), keepdims=True)
        var = jnp.var(x, axis=(0, 2, 3), keepdims=True)
        xn = (x - mean) / jnp.sqrt(var + BN_EPS)
        return xn * g[None, :, None, None] + b[None, :, None, None]

    out = jax.nn.relu(bn(conv(x, params["w1"], stride, 1),
                         params["g1"], params["be1"]))
    out = bn(conv(out, params["w2"], 1, 1), params["g2"], params["be2"])
    in_planes = x.shape[1]
    planes = params["w1"].shape[0]
    if stride != 1 or in_planes != planes:
        sc = bn(conv(x, params["ws"], stride, 0), params["gs"], params["bes"])
    else:
        sc = x
    return jax.nn.relu(out + sc)


# ---------------------------------------------------------------------------
def _make_params(key, in_planes, planes):
    k1, k2, k3 = jax.random.split(key, 3)
    return {
        "w1": jax.random.normal(k1, (planes, in_planes, 3, 3), jnp.float32) * 0.1,
        "g1": jnp.ones((planes,), jnp.float32),
        "be1": jnp.zeros((planes,), jnp.float32),
        "w2": jax.random.normal(k2, (planes, planes, 3, 3), jnp.float32) * 0.1,
        "g2": jnp.ones((planes,), jnp.float32),
        "be2": jnp.zeros((planes,), jnp.float32),
        "ws": jax.random.normal(k3, (planes, in_planes, 1, 1), jnp.float32) * 0.1,
        "gs": jnp.ones((planes,), jnp.float32),
        "bes": jnp.zeros((planes,), jnp.float32),
    }


if __name__ == "__main__":
    key = jax.random.PRNGKey(0)
    kp1, kp2, kx1, kx2 = jax.random.split(key, 4)

    # Intermediates are stored in bf16 and the matmuls run on the bf16 MXU
    # path (f32 accumulation), so the tolerance covers bf16 rounding through
    # two convolutions + BatchNorm vs. the f32 HIGHEST reference.  Structural
    # errors would be O(1).
    TOL = 5e-2

    # Case 1: projection shortcut (stride 2, channel expansion).
    in_planes, planes, stride = 4, 8, 2
    N, H, W = 2, 16, 16
    params = _make_params(kp1, in_planes, planes)
    x = jax.random.normal(kx1, (N, in_planes, H, W), jnp.float32)
    out = jax.block_until_ready(basic_block_forward(x, params, stride))
    ref = jax.block_until_ready(ref_basic_block(x, params, stride))
    assert out.shape == ref.shape == (N, planes, H // stride, W // stride)
    err1 = float(jnp.max(jnp.abs(out - ref)))
    assert err1 < TOL, f"projection-shortcut max abs err = {err1}"

    # Case 2: identity shortcut (stride 1, same channels).
    in_planes2, planes2, stride2 = 8, 8, 1
    params2 = _make_params(kp2, in_planes2, planes2)
    x2 = jax.random.normal(kx2, (N, in_planes2, H, W), jnp.float32)
    out2 = jax.block_until_ready(basic_block_forward(x2, params2, stride2))
    ref2 = jax.block_until_ready(ref_basic_block(x2, params2, stride2))
    assert out2.shape == ref2.shape == (N, planes2, H, W)
    err2 = float(jnp.max(jnp.abs(out2 - ref2)))
    assert err2 < TOL, f"identity-shortcut max abs err = {err2}"

    print(f"max abs err: projection={err1:.2e}, identity={err2:.2e}")
    print("KERNEL_OK")
</pallas_src>

<mosaic_0001>
module attributes {stable_mosaic.version = 11 : i64} {
  func.func @kernel(%arg0: i32, %arg1: i32, %arg2: memref<1x9x9x16xbf16, #tpu.memory_space<vmem>>, %arg3: memref<36x128xbf16, #tpu.memory_space<vmem>>, %arg4: memref<1x64x128xbf16, #tpu.memory_space<vmem>>, %arg5: memref<1x1x2x128xf32, #tpu.memory_space<vmem>>, %arg6: memref<64x36xbf16, #tpu.memory_space<vmem>>) attributes {dimension_semantics = [#tpu.dimension_semantics<parallel>, #tpu.dimension_semantics<parallel>], iteration_bounds = array<i64: 2, 1>, scalar_prefetch = 0 : i64, scratch_operands = 1 : i64, tpu.core_type = #tpu.core_type<tc>, window_params = [{transform_indices = @transform_0, window_bounds = array<i64: 1, 9, 9, 16>}, {pipeline_mode = #tpu.pipeline_mode<synchronous>, transform_indices = @transform_1, window_bounds = array<i64: 36, 128>}, {transform_indices = @transform_2, window_bounds = array<i64: 1, 64, 128>}, {transform_indices = @transform_3, window_bounds = array<i64: 1, 1, 2, 128>}]} {
    %c8_i32 = arith.constant 8 : i32
    %0 = arith.muli %arg1, %c8_i32 : i32
    %c0_i32 = arith.constant 0 : i32
    %1 = arith.addi %0, %c0_i32 : i32
    %c0 = arith.constant 0 : index
    %2 = arith.index_cast %1 : i32 to index
    %c0_0 = arith.constant 0 : index
    %c0_1 = arith.constant 0 : index
    %3 = vector.load %arg2[%c0, %2, %c0_0, %c0_1] : memref<1x9x9x16xbf16, #tpu.memory_space<vmem>>, vector<1x8x8x4xbf16>
    %4 = vector.shape_cast %3 : vector<1x8x8x4xbf16> to vector<8x8x4xbf16>
    %5 = vector.shape_cast %4 : vector<8x8x4xbf16> to vector<64x4xbf16>
    %c0_2 = arith.constant 0 : index
    %c0_3 = arith.constant 0 : index
    %6 = vector.load %arg6[%c0_2, %c0_3] : memref<64x36xbf16, #tpu.memory_space<vmem>>, vector<64x4xbf16>
    tpu.vector_store %arg6[%c0_2, %c0_3], %5 {strides = array<i32>} : memref<64x36xbf16, #tpu.memory_space<vmem>>, vector<64x4xbf16>,
    %c0_i32_4 = arith.constant 0 : i32
    %7 = arith.addi %0, %c0_i32_4 : i32
    %c0_5 = arith.constant 0 : index
    %8 = arith.index_cast %7 : i32 to index
    %c0_6 = arith.constant 0 : index
    %c4 = arith.constant 4 : index
    %9 = vector.load %arg2[%c0_5, %8, %c0_6, %c4] : memref<1x9x9x16xbf16, #tpu.memory_space<vmem>>, vector<1x8x8x4xbf16>
    %10 = vector.shape_cast %9 : vector<1x8x8x4xbf16> to vector<8x8x4xbf16>
    %11 = vector.shape_cast %10 : vector<8x8x4xbf16> to vector<64x4xbf16>
    %c0_7 = arith.constant 0 : index
    %c4_8 = arith.constant 4 : index
    %12 = vector.load %arg6[%c0_7, %c4_8] : memref<64x36xbf16, #tpu.memory_space<vmem>>, vector<64x4xbf16>
    tpu.vector_store %arg6[%c0_7, %c4_8], %11 {strides = array<i32>} : memref<64x36xbf16, #tpu.memory_space<vmem>>, vector<64x4xbf16>,
    %c0_i32_9 = arith.constant 0 : i32
    %13 = arith.addi %0, %c0_i32_9 : i32
    %c0_10 = arith.constant 0 : index
    %14 = arith.index_cast %13 : i32 to index
    %c1 = arith.constant 1 : index
    %c0_11 = arith.constant 0 : index
    %15 = vector.load %arg2[%c0_10, %14, %c1, %c0_11] : memref<1x9x9x16xbf16, #tpu.memory_space<vmem>>, vector<1x8x8x4xbf16>
    %16 = vector.shape_cast %15 : vector<1x8x8x4xbf16> to vector<8x8x4xbf16>
    %17 = vector.shape_cast %16 : vector<8x8x4xbf16> to vector<64x4xbf16>
    %c0_12 = arith.constant 0 : index
    %c8 = arith.constant 8 : index
    %18 = vector.load %arg6[%c0_12, %c8] : memref<64x36xbf16, #tpu.memory_space<vmem>>, vector<64x4xbf16>
    tpu.vector_store %arg6[%c0_12, %c8], %17 {strides = array<i32>} : memref<64x36xbf16, #tpu.memory_space<vmem>>, vector<64x4xbf16>,
    %c0_i32_13 = arith.constant 0 : i32
    %19 = arith.addi %0, %c0_i32_13 : i32
    %c0_14 = arith.constant 0 : index
    %20 = arith.index_cast %19 : i32 to index
    %c0_15 = arith.constant 0 : index
    %c8_16 = arith.constant 8 : index
    %21 = vector.load %arg2[%c0_14, %20, %c0_15, %c8_16] : memref<1x9x9x16xbf16, #tpu.memory_space<vmem>>, vector<1x8x8x4xbf16>
    %22 = vector.shape_cast %21 : vector<1x8x8x4xbf16> to vector<8x8x4xbf16>
    %23 = vector.shape_cast %22 : vector<8x8x4xbf16> to vector<64x4xbf16>
    %c0_17 = arith.constant 0 : index
    %c12 = arith.constant 12 : index
    %24 = vector.load %arg6[%c0_17, %c12] : memref<64x36xbf16, #tpu.memory_space<vmem>>, vector<64x4xbf16>
    tpu.vector_store %arg6[%c0_17, %c12], %23 {strides = array<i32>} : memref<64x36xbf16, #tpu.memory_space<vmem>>, vector<64x4xbf16>,
    %c0_i32_18 = arith.constant 0 : i32
    %25 = arith.addi %0, %c0_i32_18 : i32
    %c0_19 = arith.constant 0 : index
    %26 = arith.index_cast %25 : i32 to index
    %c0_20 = arith.constant 0 : index
    %c12_21 = arith.constant 12 : index
    %27 = vector.load %arg2[%c0_19, %26, %c0_20, %c12_21] : memref<1x9x9x16xbf16, #tpu.memory_space<vmem>>, vector<1x8x8x4xbf16>
    %28 = vector.shape_cast %27 : vector<1x8x8x4xbf16> to vector<8x8x4xbf16>
    %29 = vector.shape_cast %28 : vector<8x8x4xbf16> to vector<64x4xbf16>
    %c0_22 = arith.constant 0 : index
    %c16 = arith.constant 16 : index
    %30 = vector.load %arg6[%c0_22, %c16] : memref<64x36xbf16, #tpu.memory_space<vmem>>, vector<64x4xbf16>
    tpu.vector_store %arg6[%c0_22, %c16], %29 {strides = array<i32>} : memref<64x36xbf16, #tpu.memory_space<vmem>>, vector<64x4xbf16>,
    %c0_i32_23 = arith.constant 0 : i32
    %31 = arith.addi %0, %c0_i32_23 : i32
    %c0_24 = arith.constant 0 : index
    %32 = arith.index_cast %31 : i32 to index
    %c1_25 = arith.constant 1 : index
    %c8_26 = arith.constant 8 : index
    %33 = vector.load %arg2[%c0_24, %32, %c1_25, %c8_26] : memref<1x9x9x16xbf16, #tpu.memory_space<vmem>>, vector<1x8x8x4xbf16>
    %34 = vector.shape_cast %33 : vector<1x8x8x4xbf16> to vector<8x8x4xbf16>
    %35 = vector.shape_cast %34 : vector<8x8x4xbf16> to vector<64x4xbf16>
    %c0_27 = arith.constant 0 : index
    %c20 = arith.constant 20 : index
    %36 = vector.load %arg6[%c0_27, %c20] : memref<64x36xbf16, #tpu.memory_space<vmem>>, vector<64x4xbf16>
    tpu.vector_store %arg6[%c0_27, %c20], %35 {strides = array<i32>} : memref<64x36xbf16, #tpu.memory_space<vmem>>, vector<64x4xbf16>,
    %c1_i32 = arith.constant 1 : i32
    %37 = arith.addi %0, %c1_i32 : i32
    %c0_28 = arith.constant 0 : index
    %38 = arith.index_cast %37 : i32 to index
    %c0_29 = arith.constant 0 : index
    %c0_30 = arith.constant 0 : index
    %39 = vector.load %arg2[%c0_28, %38, %c0_29, %c0_30] : memref<1x9x9x16xbf16, #tpu.memory_space<vmem>>, vector<1x8x8x4xbf16>
    %40 = vector.shape_cast %39 : vector<1x8x8x4xbf16> to vector<8x8x4xbf16>
    %41 = vector.shape_cast %40 : vector<8x8x4xbf16> to vector<64x4xbf16>
    %c0_31 = arith.constant 0 : index
    %c24 = arith.constant 24 : index
    %42 = vector.load %arg6[%c0_31, %c24] : memref<64x36xbf16, #tpu.memory_space<vmem>>, vector<64x4xbf16>
    tpu.vector_store %arg6[%c0_31, %c24], %41 {strides = array<i32>} : memref<64x36xbf16, #tpu.memory_space<vmem>>, vector<64x4xbf16>,
    %c1_i32_32 = arith.constant 1 : i32
    %43 = arith.addi %0, %c1_i32_32 : i32
    %c0_33 = arith.constant 0 : index
    %44 = arith.index_cast %43 : i32 to index
    %c0_34 = arith.constant 0 : index
    %c4_35 = arith.constant 4 : index
    %45 = vector.load %arg2[%c0_33, %44, %c0_34, %c4_35] : memref<1x9x9x16xbf16, #tpu.memory_space<vmem>>, vector<1x8x8x4xbf16>
    %46 = vector.shape_cast %45 : vector<1x8x8x4xbf16> to vector<8x8x4xbf16>
    %47 = vector.shape_cast %46 : vector<8x8x4xbf16> to vector<64x4xbf16>
    %c0_36 = arith.constant 0 : index
    %c28 = arith.constant 28 : index
    %48 = vector.load %arg6[%c0_36, %c28] : memref<64x36xbf16, #tpu.memory_space<vmem>>, vector<64x4xbf16>
    tpu.vector_store %arg6[%c0_36, %c28], %47 {strides = array<i32>} : memref<64x36xbf16, #tpu.memory_space<vmem>>, vector<64x4xbf16>,
    %c1_i32_37 = arith.constant 1 : i32
    %49 = arith.addi %0, %c1_i32_37 : i32
    %c0_38 = arith.constant 0 : index
    %50 = arith.index_cast %49 : i32 to index
    %c1_39 = arith.constant 1 : index
    %c0_40 = arith.constant 0 : index
    %51 = vector.load %arg2[%c0_38, %50, %c1_39, %c0_40] : memref<1x9x9x16xbf16, #tpu.memory_space<vmem>>, vector<1x8x8x4xbf16>
    %52 = vector.shape_cast %51 : vector<1x8x8x4xbf16> to vector<8x8x4xbf16>
    %53 = vector.shape_cast %52 : vector<8x8x4xbf16> to vector<64x4xbf16>
    %c0_41 = arith.constant 0 : index
    %c32 = arith.constant 32 : index
    %54 = vector.load %arg6[%c0_41, %c32] : memref<64x36xbf16, #tpu.memory_space<vmem>>, vector<64x4xbf16>
    tpu.vector_store %arg6[%c0_41, %c32], %53 {strides = array<i32>} : memref<64x36xbf16, #tpu.memory_space<vmem>>, vector<64x4xbf16>,
    %c0_42 = arith.constant 0 : index
    %c0_43 = arith.constant 0 : index
    %55 = vector.load %arg6[%c0_42, %c0_43] : memref<64x36xbf16, #tpu.memory_space<vmem>>, vector<64x36xbf16>
    %c0_44 = arith.constant 0 : index
    %c0_45 = arith.constant 0 : index
    %56 = vector.load %arg3[%c0_44, %c0_45] : memref<36x128xbf16, #tpu.memory_space<vmem>>, vector<36x128xbf16>
    %cst = arith.constant dense<0.000000e+00> : vector<64x128xf32>
    %57 = tpu.matmul %55, %56, %cst {dimension_numbers = #tpu.dot_dimension_numbers<[1], [0], [0], [1], [0, 0, 1, 1], [], []>} : vector<64x36xbf16>, vector<36x128xbf16>, vector<64x128xf32> -> vector<64x128xf32>
    %58 = arith.truncf %57 : vector<64x128xf32> to vector<64x128xbf16>
    %c0_46 = arith.constant 0 : index
    %c0_47 = arith.constant 0 : index
    %c0_48 = arith.constant 0 : index
    %59 = vector.load %arg4[%c0_46, %c0_47, %c0_48] : memref<1x64x128xbf16, #tpu.memory_space<vmem>>, vector<1x64x128xbf16>
    %60 = vector.shape_cast %59 : vector<1x64x128xbf16> to vector<64x128xbf16>
    %61 = vector.shape_cast %58 : vector<64x128xbf16> to vector<1x64x128xbf16>
    tpu.vector_store %arg4[%c0_46, %c0_47, %c0_48], %61 {strides = array<i32>} : memref<1x64x128xbf16, #tpu.memory_space<vmem>>, vector<1x64x128xbf16>,
    %cst_49 = arith.constant dense<0.000000e+00> : vector<128xf32>
    %62 = vector.multi_reduction <add>, %57, %cst_49 [0] : vector<64x128xf32> to vector<128xf32>
    %63 = vector.shape_cast %62 : vector<128xf32> to vector<1x128xf32>
    %c0_50 = arith.constant 0 : index
    %c0_51 = arith.constant 0 : index
    %c0_52 = arith.constant 0 : index
    %c0_53 = arith.constant 0 : index
    %64 = vector.load %arg5[%c0_50, %c0_51, %c0_52, %c0_53] : memref<1x1x2x128xf32, #tpu.memory_space<vmem>>, vector<1x1x1x128xf32>
    %65 = vector.shape_cast %64 : vector<1x1x1x128xf32> to vector<1x128xf32>
    %66 = vector.shape_cast %63 : vector<1x128xf32> to vector<1x1x1x128xf32>
    tpu.vector_store %arg5[%c0_50, %c0_51, %c0_52, %c0_53], %66 {strides = array<i32>} : memref<1x1x2x128xf32, #tpu.memory_space<vmem>>, vector<1x1x1x128xf32>,
    %67 = arith.mulf %57, %57 : vector<64x128xf32>
    %cst_54 = arith.constant dense<0.000000e+00> : vector<128xf32>
    %68 = vector.multi_reduction <add>, %67, %cst_54 [0] : vector<64x128xf32> to vector<128xf32>
    %69 = vector.shape_cast %68 : vector<128xf32> to vector<1x128xf32>
    %c0_55 = arith.constant 0 : index
    %c0_56 = arith.constant 0 : index
    %c1_57 = arith.constant 1 : index
    %c0_58 = arith.constant 0 : index
    %70 = vector.load %arg5[%c0_55, %c0_56, %c1_57, %c0_58] : memref<1x1x2x128xf32, #tpu.memory_space<vmem>>, vector<1x1x1x128xf32>
    %71 = vector.shape_cast %70 : vector<1x1x1x128xf32> to vector<1x128xf32>
    %72 = vector.shape_cast %69 : vector<1x128xf32> to vector<1x1x1x128xf32>
    tpu.vector_store %arg5[%c0_55, %c0_56, %c1_57, %c0_58], %72 {strides = array<i32>} : memref<1x1x2x128xf32, #tpu.memory_space<vmem>>, vector<1x1x1x128xf32>,
    return
  }
  func.func @transform_0(%arg0: i32, %arg1: i32) -> (i32, i32, i32, i32) {
    %c0_i32 = arith.constant 0 : i32
    %c0_i32_0 = arith.constant 0 : i32
    %c0_i32_1 = arith.constant 0 : i32
    %c0_i32_2 = arith.constant 0 : i32
    return %arg0, %c0_i32, %c0_i32_0, %c0_i32_1 : i32, i32, i32, i32
  }
  func.func @transform_1(%arg0: i32, %arg1: i32) -> (i32, i32) {
    %c0_i32 = arith.constant 0 : i32
    %c0_i32_0 = arith.constant 0 : i32
    %c0_i32_1 = arith.constant 0 : i32
    return %c0_i32, %c0_i32_0 : i32, i32
  }
  func.func @transform_2(%arg0: i32, %arg1: i32) -> (i32, i32, i32) {
    %c0_i32 = arith.constant 0 : i32
    %c0_i32_0 = arith.constant 0 : i32
    return %arg0, %arg1, %c0_i32 : i32, i32, i32
  }
  func.func @transform_3(%arg0: i32, %arg1: i32) -> (i32, i32, i32, i32) {
    %c0_i32 = arith.constant 0 : i32
    %c0_i32_0 = arith.constant 0 : i32
    %c0_i32_1 = arith.constant 0 : i32
    return %arg0, %arg1, %c0_i32, %c0_i32_0 : i32, i32, i32, i32
  }
}

</mosaic_0001>

<bundles_post_ra>
// kernel: tpu_custom_call.1
= control target key start
LH: loop header
LB: loop body
LE: loop exit
PB: predicated region body
PF: predicated region fallthrough
CT: control target
= control target key end

     0   :  { %9 = vsyncpa [#allocation4], 0  ;;  %s2011_s0 = inlined_call_operand.vmem [shape: bf16[2,9,9,16], index: 0, kind: input, shape index: {}]   ;;  %s2012_s1 = inlined_call_operand.vmem [shape: bf16[36,128], index: 1, kind: input, shape index: {}]   ;;  %s2013_s2 = inlined_call_operand.hbm [shape: bf16[2,64,128], index: 2, kind: output, shape index: {0}]   ;;  %s2014_s3 = inlined_call_operand.hbm [shape: f32[2,1,2,128], index: 3, kind: output, shape index: {1}]  }
   0x1   :  { %11 = vsyncpa [#allocation4 + $0x1], 0 }
   0x2   :  { %12 = vsyncpa [#allocation6], 0 }
   0x3   :  { %14 = vsyncpa [#allocation6 + $0x1], 0  ;;  %s1656_s12 = smov 0   ;;  %s1658_s13 = smov 0  }
   0x4   :  { %s1660_s14 = smov 0   ;;  %s1662_s15 = smov 0  }
   0x5   :  { %s1664_s16 = smov 0   ;;  %s1666_s17 = smov 0  }
   0x6 LB: > { %s1263_s18 = sadd.s32 4294967295, %s1626_s17   ;;  %s1264_s19 = sadd.s32 4294967294, %s1626_s17   ;;  %s1626_s17 = sphi %s1666_s17, %s20_s17   ;;  %s1622_s16 = sphi %s1664_s16, %s2023_s16   ;;  %s1618_s15 = sphi %s1662_s15, %s2022_s15   ;;  %s1614_s14 = sphi %s1660_s14, %s2021_s14   ;;  %s1610_s13 = sphi %s1658_s13, %s2020_s13   ;;  %s1606_s12 = sphi %s1656_s12, %s2019_s12  }
   0x7   : > { %s32_s20 = sadd.s32 1, %s1622_s16  ;;  %s88_s21 = sadd.s32 1, %s1614_s14 }
   0x8   : > { %p34_p0 = scmp.ge.s32.totalorder %s32_s20, 2  ;;  %p98_p1 = scmp.ne.s32.totalorder %s1614_s14, %s1610_s13 }
   0x9   : > { %p99_p2 = scmp.eq.s32.totalorder %s1263_s18, 1  ;;  %p104_p3 = scmp.ne.s32.totalorder %s1610_s13, %s1606_s12 }
   0xa   : > { %s2025_s20 = smov (%p34_p0, %s32_s20), 0  ;;  %p105_p5 = scmp.eq.s32.totalorder %s1264_s19, 1 }
   0xb   : > { %p1696_p4 = por %p99_p2, %p98_p1  ;;  %s83_s23 = ssub.s32 %s1622_s16, %s2025_s20 }
   0xc   : > { %p1267_p6 = scmp.ge.s32.totalorder %s1626_s17, 1  ;;  %p86_p7 = scmp.eq.s32.totalorder %s83_s23, 0 }
   0xd   : > { %p1703_p8 = por %p105_p5, %p104_p3  ;;  %p162_p9 = scmp.lt.s32.totalorder %s1626_s17, 3 }
   0xe   : > { %s1709_s25 = scalar_select %p86_p7, %s1614_s14, %s88_s21  }
   0xf   : > { %p163_p10 = pnand %p1267_p6, %p162_p9 }
  0x10   : > { %p191_p11 = scmp.lt.s32.totalorder (!%p163_p10), %s1618_s15, 1  ;;  %vm292_vm0 = vsmask.f32 (!%p163_p10), 3328  ;;  %vm293_vm1 = vsmask.f32 (!%p163_p10), 7440  ;;  %s1628_s4 = smov (!%p163_p10), 4  }
  0x11   : > { %166 = sbr.rel (%p163_p10) target bundleno = 484 (0x1e4), region = 28  ;;  %s1629_s5 = smov (!%p163_p10), 24   ;;  %vm1739_vm2 = vmor (!%p163_p10), %vm292_vm0, %vm293_vm1  ;;  %vm234_vm3 = vcmask (!%p163_p10), 31744   ;;  %vm271_vm4 = vcmask (!%p163_p10), 64544   ;;  %vm971_vm5 = vcmask (!%p163_p10), 1041408   ;;  %vm431_vm6 = vcmask (!%p163_p10), 97344  }
  0x12   : > { %s1630_s6 = smov (!%p163_p10), 8   ;;  %s1631_s9 = smov (!%p163_p10), 12   ;;  %vm476_vm7 = vcmask (!%p163_p10), 130144   ;;  %vm521_vm8 = vcmask (!%p163_p10), 162944   ;;  %vm678_vm9 = vcmask (!%p163_p10), 195744   ;;  %vm727_vm10 = vcmask (!%p163_p10), 228544  }
  0x13   : > { %s1632_s18 = smov (!%p163_p10), 32   ;;  %vm772_vm11 = vcmask (!%p163_p10), 261344   ;;  %vm929_vm12 = vcmask (!%p163_p10), 294144   ;;  %vm958_vm13 = vcmask (!%p163_p10), 293888   ;;  %s1922_s23 = sand.u32 (!%p163_p10), 1, %s1610_s13  }
  0x14   : > { %s1369_s29 = sshll.u32 (!%p163_p10), %s1618_s15, 9  ;;  %s1117_s7 = scalar_lea.sflag (!%p163_p10), [#allocation4], %s1922_s23 }
  0x18   : > { %s192_s26 = scalar_select %p191_p11, %s1618_s15, 1 }
  0x1a   : > { %s1422_s27 = smul.u32 72, %s192_s26  ;;  %s1268_s26 = sshll.u32 %s1922_s23, 5 }
  0x1c   : > { %s1716_s30 = scalar_lea.vmem %s2011_s0, %s1422_s27  ;;  %s183_s27 = scalar_lea.vmem [#allocation3], %s1268_s26 }
  0x1d   : > { %v1489_v0 = vld [vmem:[%s1716_s30] ss:$8 sps:$4 sm:$0xff]   ;;  %v1491_v2 = vld [vmem:[%s1716_s30 + $0x10] ss:$8 sps:$4 sm:$0xff]   ;;  %v277_v6 = vld [vmem:[%s1716_s30 + $0x4] sm:$0x1] }
  0x1e   : > { %v1490_v1 = vld [vmem:[%s1716_s30] ss:$8 sps:$4 sm:$0xff]   ;;  %464 = vrot.lane.b32.xlu1 %v1489_v0, %s1628_s4  ;;  %v1493_v4 = vld [vmem:[%s1716_s30 + $0x10] ss:$8 sps:$4 sm:$0xff]   ;;  %v279_v8 = vld [vmem:[%s1716_s30 + $0xc] sm:$0x1] }
  0x1f   : > { %509 = vrot.lane.b32.xlu0 %v1490_v1, %s1628_s4  ;;  %v1492_v3 = vld [vmem:[%s1716_s30 + $0x8] ss:$8 sps:$4 sm:$0xff]   ;;  %v276_v5 = vld [vmem:[%s1716_s30] sm:$0xf]  ;;  %v305_v11 = vshll.u32 %v277_v6, 16  ;;  %v319_v14 = vshll.u32 %v279_v8, 16 }
  0x20   : > { %v278_v7 = vld [vmem:[%s1716_s30 + $0x8] sm:$0xf]  ;;  %v296_v9 = vshrl.u32 %v276_v5, 16  ;;  %v299_v10 = vshll.u32 %v276_v5, 16  ;;  %v1494_v19 = vld [vmem:[%s1716_s30 + $0x18] ss:$8 sps:$4 sm:$0xff]  }
  0x21   : > { %v310_v12 = vshrl.u32 %v278_v7, 16  ;;  %v313_v13 = vshll.u32 %v278_v7, 16  ;;  %v307_v17 = vrot.slane %v305_v11, 5  ;;  %v321_v21 = vrot.slane %v319_v14, 5  ;;  %v280_v22 = vld [vmem:[%s1716_s30 + $0x10] sm:$0xf] }
  0x22   : > { %466 = vrot.lane.b32.xlu1 %v1491_v2, %s1628_s4  ;;  %v298_v15 = vrot.slane %v296_v9, 4  ;;  %v301_v16 = vrot.slane %v299_v10, 5  ;;  %v281_v23 = vld [vmem:[%s1716_s30 + $0x14] sm:$0x1]  ;;  %v282_v25 = vld [vmem:[%s1716_s30 + $0x18] sm:$0xf] }
  0x23   : > { %715 = vrot.lane.b32.xlu0 %v1492_v3, %s1629_s5  ;;  %v312_v18 = vrot.slane %v310_v12, 4  ;;  %v315_v20 = vrot.slane %v313_v13, 5  ;;  %v283_v26 = vld [vmem:[%s1716_s30 + $0x1c] sm:$0x1]  ;;  %v324_v27 = vshrl.u32 %v280_v22, 16  ;;  %v327_v28 = vshll.u32 %v280_v22, 16 }
  0x24   : > { %v302_v24 = vor.u32 %v301_v16, %v298_v15  ;;  %v333_v31 = vshll.u32 %v281_v23, 16  ;;  %v338_v32 = vshrl.u32 %v282_v25, 16  ;;  %v341_v33 = vshll.u32 %v282_v25, 16  ;;  %v530_v34 = vld [vmem:[%s1716_s30 + $0x10] sm:$0xf]  ;;  %s1137_s28 = sshll.u32 %s183_s27, 4  ;;  %s1926_s28 = int_to_ptr.vmem [resolvable:$true] %s1137_s28 }
  0x25   : > { %v316_v30 = vor.u32 %v315_v20, %v312_v18  ;;  %v326_v36 = vrot.slane %v324_v27, 4  ;;  %v329_v37 = vrot.slane %v327_v28, 5  ;;  %v347_v38 = vshll.u32 %v283_v26, 16  ;;  %v531_v39 = vld [vmem:[%s1716_s30 + $0x14] sm:$0x1]  ;;  %s1516_s8 = scalar_lea.vmem %s1926_s28, 512 }
  0x26   : > { %511 = vrot.lane.b32.xlu1 %v1493_v4, %s1628_s4  ;;  %v303_v35 = vrot.slane %v302_v24, 4  ;;  %v335_v41 = vrot.slane %v333_v31, 5  ;;  %v340_v42 = vrot.slane %v338_v32, 4  ;;  %v343_v43 = vrot.slane %v341_v33, 5  ;;  %v532_v44 = vld [vmem:[%s1716_s30 + $0x18] sm:$0xf]  ;;  %p1517_p12 = scmp.ne.s32.totalorder %s1926_s28, %s1516_s8 }
  0x27   : > { %v317_v40 = vrot.slane %v316_v30, 4  ;;  %v330_v46 = vor.u32 %v329_v37, %v326_v36  ;;  %v349_v47 = vrot.slane %v347_v38, 5  ;;  %v533_v48 = vld [vmem:[%s1716_s30 + $0x1c] sm:$0x1]  ;;  %v571_v49 = vshrl.u32 %v530_v34, 16 }
  0x28   : > { %v308_v45 = vsel %vm1739_vm2, %v303_v35, %v307_v17  ;;  %v344_v51 = vor.u32 %v343_v43, %v340_v42  ;;  %v574_v52 = vshll.u32 %v530_v34, 16  ;;  %v580_v53 = vshll.u32 %v531_v39, 16  ;;  %v526_v54 = vld [vmem:[%s1716_s30] sm:$0xf]  ;;  %v527_v55 = vld [vmem:[%s1716_s30 + $0x4] sm:$0x1]  ;;  %p1518_p13 = pnand %p1517_p12, %p1696_p4 }
  0x29   : > { %v322_v50 = vsel %vm1739_vm2, %v317_v40, %v321_v21  ;;  %v331_v57 = vrot.slane %v330_v46, 4  ;;  %v573_v58 = vrot.slane %v571_v49, 4  ;;  %v585_v59 = vshrl.u32 %v532_v44, 16  ;;  %v528_v60 = vld [vmem:[%s1716_s30 + $0x8] sm:$0xf]  ;;  %v1509_v39 = vld [vmem:[%s2012_s1] sm:$0xff]  }
  0x2a   : > { %717 = vrot.lane.b32.xlu1 %v1494_v19, %s1629_s5  ;;  %v1279_v56 = vcombine.low %v308_v45, %v322_v50  ;;  %v345_v61 = vrot.slane %v344_v51, 4  ;;  %v576_v62 = vrot.slane %v574_v52, 5  ;;  %v582_v63 = vrot.slane %v580_v53, 5  ;;  %v529_v8 = vld [vmem:[%s1716_s30 + $0xc] sm:$0x1]  ;;  %1400 = vmatprep.subr.bf16.mxu0 %v1509_v39  ;;  %p1519_p0 = pneg %p1518_p13 }
  0x2b   : > { %v588_v0 = vshll.u32 %v532_v44, 16  ;;  %v336_v1 = vsel %vm1739_vm2, %v331_v57, %v335_v41  ;;  %v587_v2 = vrot.slane %v585_v59, 4  ;;  %v594_v3 = vshll.u32 %v533_v48, 16  ;;  %v1319_v21 = vld [vmem:[%s1716_s30 + $0x8] sm:$0xf]  ;;  %1414 = vmatprep.subr.bf16.mxu1 %v1509_v39  ;;  %1401 = vmatpush3.bf16.msra.mxu0 %v1509_v39 }
  0x2c   : > { %419 = vrot.lane.b32.xlu0 %v1279_v56, %s1630_s6  ;;  %v543_v4 = vshrl.u32 %v526_v54, 16  ;;  %v350_v5 = vsel %vm1739_vm2, %v345_v61, %v349_v47  ;;  %v577_v6 = vor.u32 %v576_v62, %v573_v58  ;;  %v546_v9 = vshll.u32 %v526_v54, 16  ;;  %v1320_v26 = vld [vmem:[%s1716_s30 + $0xc] sm:$0x1]  ;;  %v1321_v27 = vld [vmem:[%s1716_s30 + $0x10] sm:$0xf]  ;;  %1417 = vmatpush3.bf16.msra.mxu1 %v1509_v39 }
  0x2d   : > { %v590_v7 = vrot.slane %v588_v0, 5  ;;  %v1280_v10 = vcombine.low %v336_v1, %v350_v5  ;;  %v596_v11 = vrot.slane %v594_v3, 5  ;;  %v552_v13 = vshll.u32 %v527_v55, 16  ;;  %v1322_v31 = vld [vmem:[%s1716_s30 + $0x14] sm:$0x1]  ;;  %v1510_v1 = vld [vmem:[%s2012_s1 + $0x8] sm:$0xff]  }
  0x2e   : > { %v545_v12 = vrot.slane %v543_v4, 4  ;;  %v578_v14 = vrot.slane %v577_v6, 4  ;;  %v548_v16 = vrot.slane %v546_v9, 5  ;;  %v557_v17 = vshrl.u32 %v528_v60, 16  ;;  %v1323_v38 = vld [vmem:[%s1716_s30 + $0x18] sm:$0xf]  ;;  %1402 = vmatprep.subr.bf16.mxu0 %v1510_v1  ;;  %1415 = vmatprep.subr.bf16.mxu1 %v1510_v1 }
  0x2f   : > { %v591_v15 = vor.u32 %v590_v7, %v587_v2  ;;  %v554_v18 = vrot.slane %v552_v13, 5  ;;  %v560_v19 = vshll.u32 %v528_v60, 16  ;;  %v566_v20 = vshll.u32 %v529_v8, 16  ;;  %v1324_v44 = vld [vmem:[%s1716_s30 + $0x1c] sm:$0x1]  ;;  %1403 = vmatpush3.bf16.msra.mxu0 %v1510_v1 }
  0x30   : > { %421 = vrot.lane.b32.xlu0 %v1280_v10, %s1630_s6  ;;  %v583_v22 = vsel %vm1739_vm2, %v578_v14, %v582_v63  ;;  %v549_v24 = vor.u32 %v548_v16, %v545_v12  ;;  %v559_v25 = vrot.slane %v557_v17, 4  ;;  %v794_v32 = vshrl.u32 %v1319_v21, 16  ;;  %v1325_v45 = vld [vmem:[%s1716_s30 + $0x20] sm:$0xf]  ;;  %v1326_v56 = vld [vmem:[%s1716_s30 + $0x24] sm:$0x1]  ;;  %1418 = vmatpush3.bf16.msra.mxu1 %v1510_v1 }
  0x31   : > { %v592_v23 = vrot.slane %v591_v15, 4  ;;  %v562_v28 = vrot.slane %v560_v19, 5  ;;  %v568_v30 = vrot.slane %v566_v20, 5  ;;  %v797_v33 = vshll.u32 %v1319_v21, 16  ;;  %v1496_v51 = vld [vmem:[%s1716_s30 + $0x18] ss:$8 sps:$4 sm:$0xff]  }
  0x32   : > { %v550_v35 = vrot.slane %v549_v24, 4  ;;  %v803_v36 = vshll.u32 %v1320_v26, 16  ;;  %v808_v37 = vshrl.u32 %v1321_v27, 16  ;;  %v796_v42 = vrot.slane %v794_v32, 4  ;;  %v284_v0 = vld [vmem:[%s1716_s30 + $0x20] sm:$0xf] }
  0x33   : > { %v597_v34 = vsel %vm1739_vm2, %v592_v23, %v596_v11  ;;  %v563_v41 = vor.u32 %v562_v28, %v559_v25  ;;  %v799_v43 = vrot.slane %v797_v33, 5  ;;  %v811_v49 = vshll.u32 %v1321_v27, 16  ;;  %v1495_v3 = vld [vmem:[%s1716_s30 + $0x8] ss:$8 sps:$4 sm:$0xff]   ;;  %v285_v7 = vld [vmem:[%s1716_s30 + $0x24] sm:$0x1] }
  0x34   : > { %v1292_v40 = vcombine.low %v583_v22, %v597_v34  ;;  %v555_v46 = vsel %vm1739_vm2, %v550_v35, %v554_v18  ;;  %v805_v47 = vrot.slane %v803_v36, 5  ;;  %v810_v48 = vrot.slane %v808_v37, 4  ;;  %v286_v8 = vld [vmem:[%s1716_s30 + $0x28] sm:$0xf]  ;;  %v287_v13 = vld [vmem:[%s1716_s30 + $0x2c] sm:$0x1] }
  0x35   : > { %v564_v50 = vrot.slane %v563_v41, 4  ;;  %v800_v52 = vor.u32 %v799_v43, %v796_v42  ;;  %v817_v53 = vshll.u32 %v1322_v31, 16  ;;  %v822_v54 = vshrl.u32 %v1323_v38, 16  ;;  %v288_v18 = vld [vmem:[%s1716_s30 + $0x30] sm:$0xf] }
  0x36   : > { %668 = vrot.lane.b32.xlu1 %v1292_v40, %s1631_s9  ;;  %v813_v55 = vrot.slane %v811_v49, 5  ;;  %v825_v57 = vshll.u32 %v1323_v38, 16  ;;  %v831_v58 = vshll.u32 %v1324_v44, 16  ;;  %v836_v59 = vshrl.u32 %v1325_v45, 16  ;;  %v289_v22 = vld [vmem:[%s1716_s30 + $0x34] sm:$0x1] }
  0x37   : > { %v569_v60 = vsel %vm1739_vm2, %v564_v50, %v568_v30  ;;  %v801_v61 = vrot.slane %v800_v52, 4  ;;  %v819_v62 = vrot.slane %v817_v53, 5  ;;  %v824_v63 = vrot.slane %v822_v54, 4  ;;  %v290_v32 = vld [vmem:[%s1716_s30 + $0x38] sm:$0xf] }
  0x38   : > { %v1291_v2 = vcombine.low %v555_v46, %v569_v60  ;;  %v814_v4 = vor.u32 %v813_v55, %v810_v48  ;;  %v827_v5 = vrot.slane %v825_v57, 5  ;;  %v833_v6 = vrot.slane %v831_v58, 5  ;;  %v291_v38 = vld [vmem:[%s1716_s30 + $0x3c] sm:$0x1]  ;;  %v535_v60 = vld [vmem:[%s1716_s30 + $0x24] sm:$0x1] }
  0x39   : > { %v806_v9 = vsel %vm1739_vm2, %v801_v61, %v805_v47  ;;  %v838_v10 = vrot.slane %v836_v59, 4  ;;  %v839_v11 = vshll.u32 %v1325_v45, 16  ;;  %v845_v12 = vshll.u32 %v1326_v56, 16  ;;  %v534_v59 = vld [vmem:[%s1716_s30 + $0x20] sm:$0xf] }
  0x3a   : > { %762 = vrot.lane.b32.xlu1 %v1496_v51, %s1629_s5  ;;  %666 = vrot.lane.b32.xlu0 %v1291_v2, %s1631_s9  ;;  %v815_v14 = vrot.slane %v814_v4, 4  ;;  %v828_v15 = vor.u32 %v827_v5, %v824_v63  ;;  %v352_v16 = vshrl.u32 %v284_v0, 16  ;;  %v355_v17 = vshll.u32 %v284_v0, 16  ;;  %v536_v0 = vld [vmem:[%s1716_s30 + $0x28] sm:$0xf] }
  0x3b   : > { %v841_v19 = vrot.slane %v839_v11, 5  ;;  %v361_v20 = vshll.u32 %v285_v7, 16  ;;  %v366_v21 = vshrl.u32 %v286_v8, 16  ;;  %v847_v30 = vrot.slane %v845_v12, 5  ;;  %v538_v12 = vld [vmem:[%s1716_s30 + $0x30] sm:$0xf] }
  0x3c   : > { %v820_v23 = vsel %vm1739_vm2, %v815_v14, %v819_v62  ;;  %v829_v24 = vrot.slane %v828_v15, 4  ;;  %v354_v25 = vrot.slane %v352_v16, 4  ;;  %v357_v26 = vrot.slane %v355_v17, 5 }
  0x3d   : > { %v1335_v27 = vcombine.low %v806_v9, %v820_v23  ;;  %v842_v28 = vor.u32 %v841_v19, %v838_v10  ;;  %v368_v31 = vrot.slane %v366_v21, 4  ;;  %v369_v35 = vshll.u32 %v286_v8, 16  ;;  %v1497_v10 = vld [vmem:[%s1716_s30 + $0x20] ss:$8 sps:$4 sm:$0xff]   ;;  %v541_v21 = vld [vmem:[%s1716_s30 + $0x3c] sm:$0x1] }
  0x3e   : > { %760 = vrot.lane.b32.xlu0 %v1495_v3, %s1629_s5  ;;  %v834_v33 = vsel %vm1739_vm2, %v829_v24, %v833_v6  ;;  %v358_v34 = vor.u32 %v357_v26, %v354_v25  ;;  %v375_v36 = vshll.u32 %v287_v13, 16  ;;  %v380_v39 = vshrl.u32 %v288_v18, 16  ;;  %v537_v3 = vld [vmem:[%s1716_s30 + $0x2c] sm:$0x1]  ;;  %v539_v13 = vld [vmem:[%s1716_s30 + $0x34] sm:$0x1] }
  0x3f   : > { %v843_v37 = vrot.slane %v842_v28, 4  ;;  %v383_v40 = vshll.u32 %v288_v18, 16  ;;  %v389_v41 = vshll.u32 %v289_v22, 16  ;;  %v363_v43 = vrot.slane %v361_v20, 5  ;;  %v540_v18 = vld [vmem:[%s1716_s30 + $0x38] sm:$0xf] }
  0x40   : > { %v359_v42 = vrot.slane %v358_v34, 4  ;;  %v371_v44 = vrot.slane %v369_v35, 5  ;;  %v394_v45 = vshrl.u32 %v290_v32, 16  ;;  %v382_v47 = vrot.slane %v380_v39, 4 }
  0x41   : > { %v848_v46 = vsel %vm1739_vm2, %v843_v37, %v847_v30  ;;  %v385_v48 = vrot.slane %v383_v40, 5  ;;  %v377_v51 = vrot.slane %v375_v36, 5  ;;  %v391_v52 = vrot.slane %v389_v41, 5  ;;  %v1498_v41 = vld [vmem:[%s1716_s30 + $0x30] ss:$8 sps:$4 sm:$0xff]  }
  0x42   : > { %917 = vrot.lane.b32.xlu0 %v1335_v27, %s1632_s18  ;;  %v1336_v49 = vcombine.low %v834_v33, %v848_v46  ;;  %v372_v50 = vor.u32 %v371_v44, %v368_v31  ;;  %v396_v54 = vrot.slane %v394_v45, 4  ;;  %v397_v55 = vshll.u32 %v290_v32, 16  ;;  %v1499_v33 = vld [vmem:[%s1716_s30 + $0x20] ss:$8 sps:$4 sm:$0xff]  }
  0x43   : > { %v386_v53 = vor.u32 %v385_v48, %v382_v47  ;;  %v403_v56 = vshll.u32 %v291_v38, 16  ;;  %v364_v57 = vsel %vm1739_vm2, %v359_v42, %v363_v43  ;;  %v599_v1 = vshrl.u32 %v534_v59, 16  ;;  %v1500_v47 = vld [vmem:[%s1716_s30 + $0x30] ss:$8 sps:$4 sm:$0xff]  }
  0x44   : > { %919 = vrot.lane.b32.xlu1 %v1336_v49, %s1632_s18  ;;  %v373_v58 = vrot.slane %v372_v50, 4  ;;  %v399_v62 = vrot.slane %v397_v55, 5  ;;  %v602_v4 = vshll.u32 %v534_v59, 16  ;;  %v608_v5 = vshll.u32 %v535_v60, 16  ;;  %v1329_v55 = vld [vmem:[%s1716_s30 + $0x30] sm:$0xf] }
  0x45   : > { %v387_v61 = vrot.slane %v386_v53, 4  ;;  %v405_v63 = vrot.slane %v403_v56, 5  ;;  %v613_v6 = vshrl.u32 %v536_v0, 16  ;;  %v601_v11 = vrot.slane %v599_v1, 4  ;;  %v1328_v53 = vld [vmem:[%s1716_s30 + $0x2c] sm:$0x1] }
  0x46   : > { %v378_v2 = vsel %vm1739_vm2, %v373_v58, %v377_v51  ;;  %v400_v9 = vor.u32 %v399_v62, %v396_v54  ;;  %v604_v14 = vrot.slane %v602_v4, 5  ;;  %v610_v15 = vrot.slane %v608_v5, 5  ;;  %v1330_v56 = vld [vmem:[%s1716_s30 + $0x34] sm:$0x1]  ;;  %v1501_v60 = vld [vmem:[%s1716_s30 + $0x28] ss:$8 sps:$4 sm:$0xff]  }
  0x47   : > { %v1281_v7 = vcombine.low %v364_v57, %v378_v2  ;;  %v392_v8 = vsel %vm1739_vm2, %v387_v61, %v391_v52  ;;  %v615_v16 = vrot.slane %v613_v6, 4  ;;  %v616_v17 = vshll.u32 %v536_v0, 16  ;;  %v1327_v52 = vld [vmem:[%s1716_s30 + $0x28] sm:$0xf]  ;;  %v1331_v0 = vld [vmem:[%s1716_s30 + $0x38] sm:$0xf] }
  0x48   : > { %v401_v19 = vrot.slane %v400_v9, 4  ;;  %v622_v20 = vshll.u32 %v537_v3, 16  ;;  %v627_v22 = vshrl.u32 %v538_v12, 16  ;;  %v630_v23 = vshll.u32 %v538_v12, 16  ;;  %v1332_v4 = vld [vmem:[%s1716_s30 + $0x3c] sm:$0x1] }
  0x49   : > { %423 = vrot.lane.b32.xlu0 %v1281_v7, %s1630_s6  ;;  %v605_v24 = vor.u32 %v604_v14, %v601_v11  ;;  %v618_v25 = vrot.slane %v616_v17, 5  ;;  %v636_v26 = vshll.u32 %v539_v13, 16  ;;  %v641_v27 = vshrl.u32 %v540_v18, 16  ;;  %v1334_v14 = vld [vmem:[%s1716_s30 + $0x44] sm:$0x1] }
  0x4a   : > { %v406_v28 = vsel %vm1739_vm2, %v401_v19, %v405_v63  ;;  %v629_v30 = vrot.slane %v627_v22, 4  ;;  %v632_v31 = vrot.slane %v630_v23, 5  ;;  %v624_v36 = vrot.slane %v622_v20, 5 }
  0x4b   : > { %v1282_v32 = vcombine.low %v392_v8, %v406_v28  ;;  %v606_v34 = vrot.slane %v605_v24, 4  ;;  %v619_v35 = vor.u32 %v618_v25, %v615_v16  ;;  %v643_v38 = vrot.slane %v641_v27, 4  ;;  %v1503_v16 = vld [vmem:[%s1716_s30 + $0x28] ss:$8 sps:$4 sm:$0xff]  }
  0x4c   : > { %v633_v37 = vor.u32 %v632_v31, %v629_v30  ;;  %v644_v39 = vshll.u32 %v540_v18, 16  ;;  %v650_v40 = vshll.u32 %v541_v21, 16  ;;  %v638_v44 = vrot.slane %v636_v26, 5  ;;  %v1502_v21 = vld [vmem:[%s1716_s30 + $0x38] ss:$8 sps:$4 sm:$0xff]  }
  0x4d   : > { %468 = vrot.lane.b32.xlu0 %v1497_v10, %s1628_s4  ;;  %425 = vrot.lane.b32.xlu1 %v1282_v32, %s1630_s6  ;;  %v611_v42 = vsel %vm1739_vm2, %v606_v34, %v610_v15  ;;  %v620_v43 = vrot.slane %v619_v35, 4  ;;  %v850_v57 = vshrl.u32 %v1327_v52, 16  ;;  %v853_v58 = vshll.u32 %v1327_v52, 16  ;;  %v1333_v10 = vld [vmem:[%s1716_s30 + $0x40] sm:$0xf]  ;;  %s1931_s6 = scalar_lea.hbm %s2013_s2, %s1369_s29 }
  0x4e   : > { %v634_v45 = vrot.slane %v633_v37, 4  ;;  %v646_v46 = vrot.slane %v644_v39, 5  ;;  %v652_v51 = vrot.slane %v650_v40, 5  ;;  %v859_v61 = vshll.u32 %v1328_v53, 16  ;;  %v1505_v25 = vld [vmem:[%s1716_s30] ss:$8 sps:$4 sm:$0xff]  }
  0x4f   : > { %v625_v48 = vsel %vm1739_vm2, %v620_v43, %v624_v36  ;;  %v864_v62 = vshrl.u32 %v1329_v55, 16  ;;  %v867_v63 = vshll.u32 %v1329_v55, 16  ;;  %v852_v1 = vrot.slane %v850_v57, 4  ;;  %235 = vst.msk [vmem:[#allocation2] sm:$0xff] %vm234_vm3, %v1505_v25  ;;  %v1506_v34 = vld [vmem:[%s1716_s30] ss:$8 sps:$4 sm:$0xff]  }
  0x50   : > { %v1293_v49 = vcombine.low %v611_v42, %v625_v48  ;;  %v647_v50 = vor.u32 %v646_v46, %v643_v38  ;;  %v639_v54 = vsel %vm1739_vm2, %v634_v45, %v638_v44  ;;  %v855_v2 = vrot.slane %v853_v58, 5  ;;  %v1507_v37 = vld [vmem:[%s1716_s30 + $0x10] ss:$8 sps:$4 sm:$0xff]   ;;  %272 = vst.msk [vmem:[#allocation2] sm:$0xff] %vm271_vm4, %v1506_v34  ;;  %v1511_v44 = vld [vmem:[%s1716_s30 + $0x20] ss:$8 sps:$4 sm:$0xff]  }
  0x51   : > { %513 = vrot.lane.b32.xlu0 %v1499_v33, %s1628_s4  ;;  %470 = vrot.lane.b32.xlu1 %v1498_v41, %s1628_s4  ;;  %v873_v3 = vshll.u32 %v1330_v56, 16  ;;  %v878_v5 = vshrl.u32 %v1331_v0, 16  ;;  %v861_v7 = vrot.slane %v859_v61, 5  ;;  %v866_v8 = vrot.slane %v864_v62, 4  ;;  %v1504_v38 = vld [vmem:[%s1716_s30 + $0x38] ss:$8 sps:$4 sm:$0xff]  }
  0x52   : > { %v648_v59 = vrot.slane %v647_v50, 4  ;;  %v869_v9 = vrot.slane %v867_v63, 5  ;;  %v856_v12 = vor.u32 %v855_v2, %v852_v1  ;;  %v881_v18 = vshll.u32 %v1331_v0, 16  ;;  %v1508_v40 = vld [vmem:[%s1716_s30 + $0x10] ss:$8 sps:$4 sm:$0xff]   ;;  %236 = vst.msk [vmem:[#allocation2 + $0x8] sm:$0xff] %vm234_vm3, %v1507_v37 }
  0x53   : > { %v875_v13 = vrot.slane %v873_v3, 5  ;;  %v880_v15 = vrot.slane %v878_v5, 4  ;;  %v887_v19 = vshll.u32 %v1332_v4, 16  ;;  %v892_v20 = vshrl.u32 %v1333_v10, 16  ;;  %273 = vst.msk [vmem:[#allocation2 + $0x8] sm:$0xff] %vm271_vm4, %v1508_v40 }
  0x54   : > { %v653_v6 = vsel %vm1739_vm2, %v648_v59, %v652_v51  ;;  %v870_v17 = vor.u32 %v869_v9, %v866_v8  ;;  %v857_v22 = vrot.slane %v856_v12, 4  ;;  %v895_v23 = vshll.u32 %v1333_v10, 16  ;;  %v1512_v46 = vld [vmem:[%s1716_s30 + $0x20] ss:$8 sps:$4 sm:$0xff]   ;;  %237 = vst.msk [vmem:[#allocation2 + $0x10] sm:$0xff] %vm234_vm3, %v1511_v44 }
  0x55   : > { %670 = vrot.lane.b32.xlu0 %v1293_v49, %s1631_s9  ;;  %515 = vrot.lane.b32.xlu1 %v1500_v47, %s1628_s4  ;;  %v1294_v11 = vcombine.low %v639_v54, %v653_v6  ;;  %v901_v24 = vshll.u32 %v1334_v14, 16  ;;  %v883_v27 = vrot.slane %v881_v18, 5  ;;  %v889_v28 = vrot.slane %v887_v19, 5  ;;  %v1513_v48 = vld [vmem:[%s1716_s30 + $0x30] ss:$8 sps:$4 sm:$0xff]   ;;  %274 = vst.msk [vmem:[#allocation2 + $0x10] sm:$0xff] %vm271_vm4, %v1512_v46 }
  0x56   : > { %v871_v26 = vrot.slane %v870_v17, 4  ;;  %v894_v30 = vrot.slane %v892_v20, 4  ;;  %v862_v31 = vsel %vm1739_vm2, %v857_v22, %v861_v7  ;;  %v897_v32 = vrot.slane %v895_v23, 5  ;;  %v1514_v49 = vld [vmem:[%s1716_s30 + $0x30] ss:$8 sps:$4 sm:$0xff]   ;;  %238 = vst.msk [vmem:[#allocation2 + $0x18] sm:$0xff] %vm234_vm3, %v1513_v48 }
  0x57   : > { %v903_v33 = vrot.slane %v901_v24, 5  ;;  %v884_v36 = vor.u32 %v883_v27, %v880_v15  ;;  %v1515_v51 = vld [vmem:[%s2012_s1 + $0x10] ss:$0 sps:$4 sm:$0x33]   ;;  %275 = vst.msk [vmem:[#allocation2 + $0x18] sm:$0xff] %vm271_vm4, %v1514_v49 }
  0x58   : > { %v876_v35 = vsel %vm1739_vm2, %v871_v26, %v875_v13  ;;  %v898_v39 = vor.u32 %v897_v32, %v894_v30  ;;  %1420 = vmatprep.subr.msk.bf16.mxu0 %vm971_vm5, %v1515_v51  ;;  %v973_v29 = vsel %vm971_vm5, %v1515_v51, 0  ;;  %1421 = vmatprep.subr.msk.bf16.mxu1 %vm971_vm5, %v1515_v51 }
  0x59   : > { %719 = vrot.lane.b32.xlu0 %v1501_v60, %s1629_s5  ;;  %672 = vrot.lane.b32.xlu1 %v1294_v11, %s1631_s9  ;;  %v1337_v41 = vcombine.low %v862_v31, %v876_v35  ;;  %v885_v42 = vrot.slane %v884_v36, 4  ;;  %s1633_s9 = smov [#allocation3]  }
  0x5a   : > { %v899_v43 = vrot.slane %v898_v39, 4  ;;  %1405 = vmatpush3.bf16.msra.mxu0 %v973_v29  ;;  %1419 = vmatpush3.bf16.msra.mxu1 %v973_v29  ;;  %s1520_s10 = sshll.u32 %s1633_s9, 4  ;;  %s1521_s10 = int_to_ptr.vmem [resolvable:$false] %s1520_s10 }
  0x5b   : > { %v890_v45 = vsel %vm1739_vm2, %v885_v42, %v889_v28  ;;  %s1522_s11 = scalar_lea.vmem %s1521_s10, 1024  ;;  %p1523_p1 = scmp.lt.s32.totalorder %s1926_s28, %s1521_s10 }
  0x5c   : > { %v904_v47 = vsel %vm1739_vm2, %v899_v43, %v903_v33  ;;  %p1524_p2 = scmp.lt.s32.totalorder %s1522_s11, %s1516_s8 }
  0x5d   : > { %764 = vrot.lane.b32.xlu0 %v1503_v16, %s1629_s5  ;;  %721 = vrot.lane.b32.xlu1 %v1502_v21, %s1629_s5  ;;  %v1338_v50 = vcombine.low %v890_v45, %v904_v47 }
  0x5e   : > { %p1525_p3 = por %p1524_p2, %p1523_p1 }
  0x60   : > { %p1526_p5 = pnand %p1525_p3, %p1519_p0 }
  0x61   : > { %921 = vrot.lane.b32.xlu0 %v1337_v41, %s1632_s18  ;;  %766 = vrot.lane.b32.xlu1 %v1504_v38, %s1629_s5 }
  0x65   : > { %923 = vrot.lane.b32.xlu1 %v1338_v50, %s1632_s18 }
  0x90   : > { %v465_v52 = vpop.permute.xlu1 %464 }
  0x91   : > { %v510_v53 = vpop.permute.xlu0 %509 }
  0x94   : > { %v467_v54 = vpop.permute.xlu1 %466 }
  0x95   : > { %v716_v55 = vpop.permute.xlu0 %715 }
  0x98   : > { %v512_v56 = vpop.permute.xlu1 %511 }
  0x9c   : > { %v718_v58 = vpop.permute.xlu1 %717 }
  0x9e   : > { %v420_v57 = vpop.permute.xlu0 %419 }
  0x9f   : > { %432 = vst.msk [vmem:[#allocation2] sm:$0xff] %vm431_vm6, %v420_v57 }
  0xa0   : > { %477 = vst.msk [vmem:[#allocation2] sm:$0xff] %vm476_vm7, %v465_v52 }
  0xa1   : > { %522 = vst.msk [vmem:[#allocation2] sm:$0xff] %vm521_vm8, %v510_v53 }
  0xa2   : > { %v422_v59 = vpop.permute.xlu0 %421 }
  0xa3   : > { %433 = vst.msk [vmem:[#allocation2 + $0x8] sm:$0xff] %vm431_vm6, %v422_v59 }
  0xa4   : > { %478 = vst.msk [vmem:[#allocation2 + $0x8] sm:$0xff] %vm476_vm7, %v467_v54 }
  0xa5   : > { %523 = vst.msk [vmem:[#allocation2 + $0x8] sm:$0xff] %vm521_vm8, %v512_v56 }
  0xa8   : > { %v669_v60 = vpop.permute.xlu1 %668 }
  0xa9   : > { %680 = vst.msk [vmem:[#allocation2 + $0x8] sm:$0xff] %vm678_vm9, %v669_v60 }
  0xaa   : > { %729 = vst.msk [vmem:[#allocation2 + $0x8] sm:$0xff] %vm727_vm10, %v718_v58 }
  0xac   : > { %v763_v61 = vpop.permute.xlu1 %762  ;;  %v667_v62 = vpop.permute.xlu0 %666 }
  0xad   : > { %774 = vst.msk [vmem:[#allocation2 + $0x8] sm:$0xff] %vm772_vm11, %v763_v61 }
  0xae   : > { %679 = vst.msk [vmem:[#allocation2] sm:$0xff] %vm678_vm9, %v667_v62 }
  0xaf   : > { %728 = vst.msk [vmem:[#allocation2] sm:$0xff] %vm727_vm10, %v716_v55 }
  0xb0   : > { %v761_v63 = vpop.permute.xlu0 %760 }
  0xb1   : > { %773 = vst.msk [vmem:[#allocation2] sm:$0xff] %vm772_vm11, %v761_v63 }
  0xb4   : > { %v918_v0 = vpop.permute.xlu0 %917 }
  0xb5   : > { %930 = vst.msk [vmem:[#allocation2] sm:$0xff] %vm929_vm12, %v918_v0 }
  0xb6   : > { %v920_v1 = vpop.permute.xlu1 %919 }
  0xb7   : > { %931 = vst.msk [vmem:[#allocation2 + $0x8] sm:$0xff] %vm929_vm12, %v920_v1 }
  0xbb   : > { %v424_v2 = vpop.permute.xlu0 %423 }
  0xbc   : > { %434 = vst.msk [vmem:[#allocation2 + $0x10] sm:$0xff] %vm431_vm6, %v424_v2  ;;  %v934_v3 = vld [vmem:[#allocation2] sm:$0xff] }
  0xbd   : > { %1406 = vmatprep.mubr.msk.bf16.mxu0 %vm958_vm13, %v934_v3 }
  0xbe   : > { %v935_v4 = vld [vmem:[#allocation2 + $0x8] sm:$0xff] }
  0xbf   : > { %v469_v5 = vpop.permute.xlu0 %468  ;;  %1407 = vmatmul.mubr.msk.bf16.vlgmr.msra.gmra.mrb[0].mxu0 %vm958_vm13, %v935_v4  ;;  %v426_v6 = vpop.permute.xlu1 %425 }
  0xc0   : > { %479 = vst.msk [vmem:[#allocation2 + $0x10] sm:$0xff] %vm476_vm7, %v469_v5 }
  0xc1   : > { %435 = vst.msk [vmem:[#allocation2 + $0x18] sm:$0xff] %vm431_vm6, %v426_v6 }
  0xc3   : > { %v514_v7 = vpop.permute.xlu0 %513  ;;  %v471_v8 = vpop.permute.xlu1 %470 }
  0xc4   : > { %524 = vst.msk [vmem:[#allocation2 + $0x10] sm:$0xff] %vm521_vm8, %v514_v7 }
  0xc5   : > { %480 = vst.msk [vmem:[#allocation2 + $0x18] sm:$0xff] %vm476_vm7, %v471_v8 }
  0xc7   : > { %v671_v9 = vpop.permute.xlu0 %670  ;;  %v516_v10 = vpop.permute.xlu1 %515 }
  0xc8   : > { %681 = vst.msk [vmem:[#allocation2 + $0x10] sm:$0xff] %vm678_vm9, %v671_v9 }
  0xc9   : > { %525 = vst.msk [vmem:[#allocation2 + $0x18] sm:$0xff] %vm521_vm8, %v516_v10 }
  0xcb   : > { %v720_v11 = vpop.permute.xlu0 %719  ;;  %v673_v12 = vpop.permute.xlu1 %672 }
  0xcc   : > { %730 = vst.msk [vmem:[#allocation2 + $0x10] sm:$0xff] %vm727_vm10, %v720_v11 }
  0xcd   : > { %682 = vst.msk [vmem:[#allocation2 + $0x18] sm:$0xff] %vm678_vm9, %v673_v12 }
  0xcf   : > { %v765_v13 = vpop.permute.xlu0 %764  ;;  %v722_v14 = vpop.permute.xlu1 %721 }
  0xd0   : > { %775 = vst.msk [vmem:[#allocation2 + $0x10] sm:$0xff] %vm772_vm11, %v765_v13 }
  0xd1   : > { %731 = vst.msk [vmem:[#allocation2 + $0x18] sm:$0xff] %vm727_vm10, %v722_v14 }
  0xd3   : > { %v922_v15 = vpop.permute.xlu0 %921  ;;  %v767_v16 = vpop.permute.xlu1 %766 }
  0xd4   : > { %932 = vst.msk [vmem:[#allocation2 + $0x10] sm:$0xff] %vm929_vm12, %v922_v15 }
  0xd5   : > { %776 = vst.msk [vmem:[#allocation2 + $0x18] sm:$0xff] %vm772_vm11, %v767_v16 }
  0xd7   : > { %v924_v17 = vpop.permute.xlu1 %923 }
  0xd8   : > { %933 = vst.msk [vmem:[#allocation2 + $0x18] sm:$0xff] %vm929_vm12, %v924_v17 }
  0xdb   : > { %v936_v18 = vld [vmem:[#allocation2 + $0x10] sm:$0xff] }
  0xdc   : > { %1410 = vmatprep.mubr.msk.bf16.mxu1 %vm958_vm13, %v936_v18 }
  0xdf   : > { %v937_v19 = vld [vmem:[#allocation2 + $0x18] sm:$0xff] }
  0xe0   : > { %1411 = vmatmul.mubr.msk.bf16.vlgmr.msra.gmra.mrb[0].mxu1 %vm958_vm13, %v937_v19 }
 0x192   : > { %v1408_v20 = vpop.f32.mrb[0].mxu0 }
 0x193   : > { %v1009_v21 = vpop.f32.mrb[1].mxu0  ;;  %v1096_v30 = vmul.f32 %v1408_v20, %v1408_v20 }
 0x194   : > { %v1409_v22 = vpop.f32.mrb[2].mxu0  ;;  %v1094_v25 = vmul.f32 %v1009_v21, %v1009_v21 }
 0x195   : > { %v1378_v23 = vpack.c.bf16 %v1409_v22, %v1408_v20  ;;  %v1012_v24 = vpop.f32.mrb[3].mxu0  ;;  %v1097_v33 = vmul.f32 %v1409_v22, %v1409_v22 }
 0x196   : > { %v1373_v26 = vpack.c.bf16 %v1012_v24, %v1009_v21  ;;  %v1080_v27 = vadd.f32 %v1012_v24, %v1009_v21  ;;  %v1095_v28 = vmul.f32 %v1012_v24, %v1012_v24 }
 0x197   : > { %1390 = vst [vmem:[%s183_s27 + $0x8] sm:$0xff] %v1378_v23  }
 0x198   : > { %1374 = vst [vmem:[%s183_s27] sm:$0xff] %v1373_v26   ;;  %v1081_v31 = vadd.f32 %v1408_v20, %v1080_v27  ;;  %v1102_v32 = vadd.f32 %v1095_v28, %v1094_v25 }
 0x19a   : > { %v1103_v34 = vadd.f32 %v1102_v32, %v1096_v30  ;;  %v1082_v35 = vadd.f32 %v1409_v22, %v1081_v31 }
 0x19c   : > { %v1104_v36 = vadd.f32 %v1103_v34, %v1097_v33 }
 0x1b3   : > { %v1412_v37 = vpop.f32.mrb[0].mxu1 }
 0x1b4   : > { %v1025_v38 = vpop.f32.mrb[1].mxu1  ;;  %v1100_v48 = vmul.f32 %v1412_v37, %v1412_v37 }
 0x1b5   : > { %v1083_v39 = vadd.f32 %v1082_v35, %v1025_v38  ;;  %v1098_v40 = vmul.f32 %v1025_v38, %v1025_v38  ;;  %v1413_v41 = vpop.f32.mrb[2].mxu1 }
 0x1b6   : > { %v1388_v42 = vpack.c.bf16 %v1413_v41, %v1412_v37  ;;  %v1028_v43 = vpop.f32.mrb[3].mxu1 }
 0x1b7   : > { %v1105_v44 = vadd.f32 %v1104_v36, %v1098_v40  ;;  %v1383_v45 = vpack.c.bf16 %v1028_v43, %v1025_v38  ;;  %v1084_v46 = vadd.f32 %v1083_v39, %v1028_v43  ;;  %v1099_v47 = vmul.f32 %v1028_v43, %v1028_v43 }
 0x1b8   : > { %1392 = vst [vmem:[%s183_s27 + $0x18] sm:$0xff] %v1388_v42  }
 0x1b9   : > { %1391 = vst [vmem:[%s183_s27 + $0x10] sm:$0xff] %v1383_v45   ;;  %v1085_v49 = vadd.f32 %v1412_v37, %v1084_v46  ;;  %v1106_v50 = vadd.f32 %v1105_v44, %v1099_v47 }
 0x1ba   : > { %1529 = shalt.err (!%p1526_p5)
}
 0x1bb   : > { %s1530_s18 = scalar_lea.hbm %s1931_s6, 512  ;;  %s1534_s26 = scalar_lea.hbm %s2013_s2, 1024 }
 0x1bc   : > { %p1531_p6 = scmp.ne.s32.totalorder %s1931_s6, %s1530_s18  ;;  %p1535_p10 = scmp.lt.u32.totalorder %s1931_s6, %s2013_s2 }
 0x1bd   : > { %p1536_p11 = scmp.lt.u32.totalorder %s1534_s26, %s1530_s18  ;;  %p1538_p13 = scmp.lt.u32.totalorder %s1530_s18, %s1931_s6 }
 0x1be   : > { %p1532_p7 = pnand %p1531_p6, %p1696_p4 }
 0x1bf   : > { %p1537_p12 = por %p1536_p11, %p1535_p10 }
 0x1c0   : > { %p1533_p9 = pneg %p1532_p7 }
 0x1c1   : > { %p1539_p0 = por %p1538_p13, %p1537_p12 }
 0x1c3   : > { %p1540_p1 = pnand %p1539_p0, %p1533_p9 }
 0x1c5   : > { %1543 = shalt.err (!%p1540_p1)
}
 0x1c6   : > { %s1634_s30 = smov 64   ;;  %v1101_v51 = vmul.f32 %v1413_v41, %v1413_v41  ;;  %v1086_v29 = vadd.f32 %v1413_v41, %v1085_v49  ;;  %v1107_v52 = vadd.f32 %v1106_v50, %v1100_v48  ;;  %s1269_s5 = sshll.u32 %s1922_s23, 1 }
 0x1c7   : > { %1423 = dma.vmem_to_hbm [thread:$0]  (%p1696_p4), %s1926_s28, 512, %s1931_s6, %s1117_s7, %s1634_s30, %s1634_s30, %s1628_s4  }
 0x1c8   : > { %v1087_v53 = vrot.slane %v1086_v29, 4  ;;  %v1108_v54 = vadd.f32 %v1107_v52, %v1101_v51  ;;  %s1358_s8 = sshll.u32 %s1618_s15, 5  ;;  %s190_s9 = scalar_lea.vmem [#allocation5], %s1269_s5 }
 0x1c9   : > { %s1154_s10 = sshll.u32 %s190_s9, 4  ;;  %s1963_s6 = scalar_lea.hbm %s2014_s3, %s1358_s8  ;;  %s1965_s10 = int_to_ptr.vmem [resolvable:$true] %s1154_s10 }
 0x1ca   : > { %v1088_v55 = vadd.f32 %v1087_v53, %v1086_v29  ;;  %v1109_v56 = vrot.slane %v1108_v54, 4  ;;  %s1122_s7 = scalar_lea.sflag [#allocation6], %s1922_s23  ;;  %s1544_s11 = scalar_lea.vmem %s1965_s10, 32 }
 0x1cb   : > { %p1545_p2 = scmp.ne.s32.totalorder %s1965_s10, %s1544_s11  ;;  %s1635_s15 = smov [#allocation5]  }
 0x1cc   : > { %v1089_v57 = vrot.slane %v1088_v55, 2  ;;  %v1110_v58 = vadd.f32 %v1109_v56, %v1108_v54  ;;  %s1548_s18 = sshll.u32 %s1635_s15, 4  ;;  %s1549_s18 = int_to_ptr.vmem [resolvable:$false] %s1548_s18 }
 0x1cd   : > { %p1546_p3 = pnand %p1545_p2, %p1696_p4  ;;  %s1550_s19 = scalar_lea.vmem %s1549_s18, 64 }
 0x1ce   : > { %v1090_v59 = vadd.f32 %v1089_v57, %v1088_v55  ;;  %v1111_v60 = vrot.slane %v1110_v58, 2  ;;  %p1551_p6 = scmp.lt.s32.totalorder %s1965_s10, %s1549_s18  ;;  %p1552_p7 = scmp.lt.s32.totalorder %s1550_s19, %s1544_s11 }
 0x1cf   : > { %p1547_p5 = pneg %p1546_p3 }
 0x1d0   : > { %v1091_v61 = vrot.slane %v1090_v59, 1  ;;  %v1112_v62 = vadd.f32 %v1111_v60, %v1110_v58  ;;  %p1553_p9 = por %p1552_p7, %p1551_p6 }
 0x1d2   : > { %v1092_v63 = vadd.f32 %v1091_v61, %v1090_v59  ;;  %v1113_v0 = vrot.slane %v1112_v62, 1  ;;  %p1554_p10 = pnand %p1553_p9, %p1547_p5 }
 0x1d4   : > { %1093 = vst [vmem:[%s190_s9] sm:$0x1] %v1092_v63  ;;  %v1114_v1 = vadd.f32 %v1113_v0, %v1112_v62 }
 0x1d6   : > { %1115 = vst [vmem:[%s190_s9 + $0x1] sm:$0x1] %v1114_v1 }
 0x1d7   : > { %1557 = shalt.err (!%p1554_p10)
}
 0x1d8   : > { %s1558_s23 = scalar_lea.hbm %s1963_s6, 32  ;;  %s1562_s27 = scalar_lea.hbm %s2014_s3, 64 }
 0x1d9   : > { %p1559_p11 = scmp.ne.s32.totalorder %s1963_s6, %s1558_s23  ;;  %p1563_p0 = scmp.lt.u32.totalorder %s1963_s6, %s2014_s3 }
 0x1da   : > { %p1564_p1 = scmp.lt.u32.totalorder %s1562_s27, %s1558_s23  ;;  %p1566_p3 = scmp.lt.u32.totalorder %s1558_s23, %s1963_s6 }
 0x1db   : > { %p1560_p12 = pnand %p1559_p11, %p1696_p4 }
 0x1dc   : > { %p1565_p2 = por %p1564_p1, %p1563_p0 }
 0x1dd   : > { %p1561_p13 = pneg %p1560_p12 }
 0x1de   : > { %p1567_p5 = por %p1566_p3, %p1565_p2 }
 0x1e0   : > { %p1568_p6 = pnand %p1567_p5, %p1561_p13 }
 0x1e2   : > { %1571 = shalt.err (!%p1568_p6)
}
 0x1e3   : > { %1424 = dma.vmem_to_hbm [thread:$0]  (%p1696_p4), %s1965_s10, 32, %s1963_s6, %s1122_s7  }
 0x1e4 PF: > { %p1434_p7 = scmp.ge.s32.totalorder %s1626_s17, 2  ;;  %s1166_s5 = sand.u32 1, %s1606_s12  }
 0x1e5   : > { %s1167_s8 = scalar_lea.sflag [#allocation4], %s1166_s5 }
 0x1e6   : > { %p1428_p9 = pnand %p1434_p7, %p1703_p8 }
 0x1e8   : > { %1597 = dma.done.wait (!%p1428_p9), %s1167_s8, 512  }
 0x1e9   : > { %1599 = vsyncadd (!%p1428_p9), %s1167_s8, 4294966784  ;;  %s1176_s9 = scalar_lea.sflag [#allocation6], %s1166_s5 }
 0x1ea   : > { %1601 = dma.done.wait (!%p1428_p9), %s1176_s9, 32  }
 0x1eb   : > { %1603 = vsyncadd (!%p1428_p9), %s1176_s9, 4294967264  ;;  %s20_s17 = sadd.s32 1, %s1626_s17   ;;  %s2019_s12 = smov %s1610_s13 }
 0x1ec   : > { %p17_p10 = scmp.ge.s32.totalorder %s20_s17, 4   ;;  %s2020_s13 = smov %s1614_s14 }
 0x1ed   : > { %s2021_s14 = smov %s1709_s25  ;;  %s2022_s15 = smov %s1622_s16 }
 0x1ee   : > { %s2023_s16 = smov %s2025_s20  ;;  %19 = sbr.rel (!%p17_p10) target bundleno = 6 (0x6), region = 82 }
 0x1f5   :  { %1181 = vsyncpa [#allocation4], 1 }
 0x1f6   :  { %1183 = vsyncpa [#allocation4 + $0x1], 1 }
 0x1f7   :  { %1184 = vsyncpa [#allocation6], 1 }
 0x1f8   :  { %1186 = vsyncpa [#allocation6 + $0x1], 1 }

</bundles_post_ra>
